<compile_context>
chip_gen: v6e
topology: v6e:2x2x1
jax: 0.10.0
libtpu: 0.0.40
codegen_flags: <defaults>
</compile_context>

<pallas_src>
import math
from functools import partial
from typing import NamedTuple

import jax
import jax.numpy as jnp
import numpy as np
from jax.experimental import pallas as pl
from jax.experimental.pallas import tpu as pltpu


class Layout(NamedTuple):
    """Static sizes + 8-aligned row offsets inside the packed [rows, C] slab."""
    nS: int
    nP: int      # nO - 1
    H: int
    nA: int
    C: int
    rows: int
    w1s: int
    w1p: int
    b1: int
    w2: int
    b2: int
    w3a: int
    w3b: int
    b3: int
    w4: int
    b4: int


def pack_params(params, nS):
    """Pack ((W1,b1),(W2,b2),(W3,b3),(W4,b4)) (weights stored [in, out]) into a
    single lane-dense [rows, 128] f32 slab, pre-transposed for the
    batch-on-lanes kernel layout.  Done once at init, not per call."""
    (w1, b1), (w2, b2), (w3, b3), (w4, b4) = params
    fc1_in, H = int(w1.shape[0]), int(w1.shape[1])
    nA = int(w2.shape[0])
    nP = fc1_in - nS
    C = 128                                     # lane-dense slab width
    assert max(H, nA, nS, nP) <= C

    sections = [
        ("w1s", w1[:nS, :].T),     # [H, nS]  fc1 weights, state part
        ("w1p", w1[nS:, :].T),     # [H, nP]  fc1 weights, point part
        ("b1",  b1.T),             # [H, 1]
        ("w2",  w2.T),             # [nA(out), nA(in)]  column a = row a of W2
        ("b2",  b2.T),             # [nA, 1]
        ("w3a", w3[:H, :].T),      # [H, H]   contraction against fc1
        ("w3b", w3[H:, :].T),      # [H, nA]  contraction against fc2
        ("b3",  b3.T),             # [H, 1]
        ("w4",  w4),               # [H, 1]
        ("b4",  b4),               # [1, 1]
    ]

    blocks, offs, off = [], {}, 0
    for name, arr in sections:
        arr = jnp.asarray(arr, jnp.float32)
        r, c = int(arr.shape[0]), int(arr.shape[1])
        r_pad = -(-r // 8) * 8                  # round rows up to sublane mult
        offs[name] = off
        blocks.append(jnp.pad(arr, ((0, r_pad - r), (0, C - c))))
        off += r_pad

    packed = jnp.concatenate(blocks, axis=0)    # [rows, 128] f32 (~40 KB here)
    layout = Layout(nS=int(nS), nP=int(nP), H=H, nA=nA, C=C, rows=int(off),
                    **offs)
    return packed, layout


def pareto_kernel(state_ref, point_ref, act_ref, params_ref, out_ref, *, L: Layout):
    H, nA, nS, nP = L.H, L.nA, L.nS, L.nP

    x_s = state_ref[...]                         # [nS, Bt] f32 (batch on lanes)
    x_p = point_ref[...]                         # [nP, Bt] f32
    act = act_ref[...]                           # [1, Bt]  int32
    Bt = act.shape[1]
    P = params_ref                               # resident packed-weight slab

    # Static, 8-aligned row slices of the packed parameter buffer.
    w1s_t = P[L.w1s:L.w1s + H, :nS]              # [H, nS]
    w1p_t = P[L.w1p:L.w1p + H, :nP]              # [H, nP]
    b1c   = P[L.b1:L.b1 + H, :1]                 # [H, 1]
    w2sel = P[L.w2:L.w2 + nA, :nA]               # [nA(out), nA(in)]
    b2c   = P[L.b2:L.b2 + nA, :1]                # [nA, 1]
    w3a_t = P[L.w3a:L.w3a + H, :H]               # [H, H]
    w3b_t = P[L.w3b:L.w3b + H, :nA]              # [H, nA]
    b3c   = P[L.b3:L.b3 + H, :1]                 # [H, 1]
    w4c   = P[L.w4:L.w4 + H, :1]                 # [H, 1]
    b4    = P[L.b4:L.b4 + 1, :1]                 # [1, 1]

    # fc1 = relu(W1s @ state + W1p @ point + b1)
    # State part on the MXU (N = Bt fills the array); the tiny K=nP point part
    # as VPU broadcast FMAs (free filler, no extra MXU push/pop round-trip).
    fc1 = jnp.dot(w1s_t, x_s, preferred_element_type=jnp.float32) + b1c
    for j in range(nP):
        fc1 = fc1 + w1p_t[:, j:j + 1] * x_p[j:j + 1, :]
    fc1 = jnp.maximum(fc1, 0.0)                  # [H, Bt]

    # fc2 = relu(one_hot(action) @ W2 + b2) == relu(W2[action, :] + b2),
    # done as a lane-wise select over nA static columns (no MXU).
    # Out-of-range / padded actions select no column -> relu(b2), matching
    # one_hot's all-zeros semantics (padded lanes are sliced off anyway).
    sel = jnp.zeros((nA, Bt), jnp.float32)
    for a in range(nA):
        m = (act == a).astype(jnp.float32)       # [1, Bt] lane mask
        sel = sel + m * w2sel[:, a:a + 1]        # broadcast FMA -> [nA, Bt]
    fc2 = jnp.maximum(sel + b2c, 0.0)            # [nA, Bt]

    # fc3 = relu(W3a @ fc1 + W3b @ fc2 + b3); fc1 part on the MXU (N = Bt),
    # the K=nA fc2 part as VPU outer-product FMAs.
    fc3 = jnp.dot(w3a_t, fc1, preferred_element_type=jnp.float32) + b3c
    for j in range(nA):
        fc3 = fc3 + w3b_t[:, j:j + 1] * fc2[j:j + 1, :]
    fc3 = jnp.maximum(fc3, 0.0)                  # [H, Bt]

    # out = W4 @ fc3 + b4 with a single output feature: VPU multiply +
    # sublane (XLU) reduction, written as a lane-dense [1, Bt] row.
    out_ref[...] = jnp.sum(fc3 * w4c, axis=0, keepdims=True) + b4


@partial(jax.jit, static_argnums=(4, 5))
def pareto_forward(state, point, action, packed, layout: Layout, b_tile=128):
    """state: [B, nS], point: [B, nO-1], action: [B] int -> [B, 1] f32."""
    B = state.shape[0]
    n_tiles = pl.cdiv(B, b_tile)
    B_pad = n_tiles * b_tile

    # Layout plumbing (fused in this jit): present lane-dense, batch-on-lanes
    # slabs to the kernel.  Padded lanes get action = -1 (selects no W2 row).
    state_t = jnp.pad(state.astype(jnp.float32).T, ((0, 0), (0, B_pad - B)))
    point_t = jnp.pad(point.astype(jnp.float32).T, ((0, 0), (0, B_pad - B)))
    act_row = jnp.pad(action.astype(jnp.int32).reshape(1, B),
                      ((0, 0), (0, B_pad - B)), constant_values=-1)

    out_row = pl.pallas_call(
        partial(pareto_kernel, L=layout),
        out_shape=jax.ShapeDtypeStruct((1, B_pad), jnp.float32),
        grid=(n_tiles,),
        in_specs=[
            pl.BlockSpec((layout.nS, b_tile), lambda i: (0, i)),
            pl.BlockSpec((layout.nP, b_tile), lambda i: (0, i)),
            pl.BlockSpec((1, b_tile), lambda i: (0, i)),
            # Constant index_map: packed weights DMA'd once, VMEM-resident.
            pl.BlockSpec((layout.rows, layout.C), lambda i: (0, 0)),
        ],
        out_specs=pl.BlockSpec((1, b_tile), lambda i: (0, i)),
        compiler_params=pltpu.CompilerParams(
            dimension_semantics=("parallel",)),
    )(state_t, point_t, act_row, packed)

    # TODO(synk): once batched traffic dominates, store the packed slab and
    # stream activations in bf16 on v6e/v7x (accumulate f32 on the MXU).
    return out_row[0, :B].reshape(B, 1)


def init_linear(key, fan_in, fan_out):
    """PyTorch nn.Linear default init; weight returned as [in, out]."""
    k = 1.0 / math.sqrt(fan_in)
    kw, kb = jax.random.split(key)
    w = jax.random.uniform(kw, (fan_in, fan_out), jnp.float32, -k, k)
    b = jax.random.uniform(kb, (1, fan_out), jnp.float32, -k, k)
    return w, b


def reference_forward(state, point, action, params):
    (w1, b1), (w2, b2), (w3, b3), (w4, b4) = params
    nA = w2.shape[0]
    inp = jnp.concatenate([state.astype(jnp.float32), point], axis=1)
    oh = jax.nn.one_hot(action, nA, dtype=jnp.float32)
    fc1 = jax.nn.relu(inp @ w1 + b1)
    fc2 = jax.nn.relu(oh @ w2 + b2)
    fc3 = jax.nn.relu(jnp.concatenate([fc1, fc2], axis=1) @ w3 + b3)
    return fc3 @ w4 + b4


if __name__ == "__main__":
    # Small shapes consistent with the module: fc1_in = nS + nO - 1.
    B, nS, nO, nA = 8, 12, 5, 4
    fc1_in = nS + nO - 1                     # 16
    hidden = fc1_in // 2                     # 8

    key = jax.random.PRNGKey(0)
    k_state, k_point, k_action, k1, k2, k3, k4 = jax.random.split(key, 7)

    state = jax.random.normal(k_state, (B, nS), jnp.float32)
    point = jax.random.normal(k_point, (B, nO - 1), jnp.float32)
    action = jax.random.randint(k_action, (B,), 0, nA, jnp.int32)

    params = (
        init_linear(k1, fc1_in, hidden),          # fc1
        init_linear(k2, nA, nA),                  # fc2
        init_linear(k3, hidden + nA, hidden),     # fc3
        init_linear(k4, hidden, 1),               # out
    )

    # One-time parameter packing (hoisted out of the per-call path).
    packed, layout = pack_params(params, nS)
    packed = jax.block_until_ready(packed)

    out = pareto_forward(state, point, action, packed, layout, 128)
    out = jax.block_until_ready(out)

    ref = reference_forward(state, point, action, params)
    np.testing.assert_allclose(np.asarray(out), np.asarray(ref),
                               rtol=1e-5, atol=1e-5)
    print("KERNEL_OK")
</pallas_src>

<mosaic_0001>
module attributes {stable_mosaic.version = 11 : i64} {
  func.func @pareto_kernel(%arg0: i32, %arg1: memref<12x128xf32, #tpu.memory_space<vmem>>, %arg2: memref<4x128xf32, #tpu.memory_space<vmem>>, %arg3: memref<1x128xi32, #tpu.memory_space<vmem>>, %arg4: memref<80x128xf32, #tpu.memory_space<vmem>>, %arg5: memref<1x128xf32, #tpu.memory_space<vmem>>) attributes {dimension_semantics = [#tpu.dimension_semantics<parallel>], iteration_bounds = array<i64: 1>, scalar_prefetch = 0 : i64, scratch_operands = 0 : i64, tpu.core_type = #tpu.core_type<tc>, window_params = [{transform_indices = @transform_0, window_bounds = array<i64: 12, 128>}, {transform_indices = @transform_1, window_bounds = array<i64: 4, 128>}, {transform_indices = @transform_2, window_bounds = array<i64: 1, 128>}, {pipeline_mode = #tpu.pipeline_mode<synchronous>, transform_indices = @transform_3, window_bounds = array<i64: 80, 128>}, {transform_indices = @transform_4, window_bounds = array<i64: 1, 128>}]} {
    %c0 = arith.constant 0 : index
    %c0_0 = arith.constant 0 : index
    %0 = vector.load %arg1[%c0, %c0_0] : memref<12x128xf32, #tpu.memory_space<vmem>>, vector<12x128xf32>
    %c0_1 = arith.constant 0 : index
    %c0_2 = arith.constant 0 : index
    %1 = vector.load %arg2[%c0_1, %c0_2] : memref<4x128xf32, #tpu.memory_space<vmem>>, vector<4x128xf32>
    %c0_3 = arith.constant 0 : index
    %c0_4 = arith.constant 0 : index
    %2 = vector.load %arg3[%c0_3, %c0_4] : memref<1x128xi32, #tpu.memory_space<vmem>>, vector<1x128xi32>
    %c0_5 = arith.constant 0 : index
    %c0_6 = arith.constant 0 : index
    %3 = vector.load %arg4[%c0_5, %c0_6] : memref<80x128xf32, #tpu.memory_space<vmem>>, vector<8x12xf32>
    %c8 = arith.constant 8 : index
    %c0_7 = arith.constant 0 : index
    %4 = vector.load %arg4[%c8, %c0_7] : memref<80x128xf32, #tpu.memory_space<vmem>>, vector<8x4xf32>
    %c16 = arith.constant 16 : index
    %c0_8 = arith.constant 0 : index
    %5 = vector.load %arg4[%c16, %c0_8] : memref<80x128xf32, #tpu.memory_space<vmem>>, vector<8x1xf32>
    %c24 = arith.constant 24 : index
    %c0_9 = arith.constant 0 : index
    %6 = vector.load %arg4[%c24, %c0_9] : memref<80x128xf32, #tpu.memory_space<vmem>>, vector<4x4xf32>
    %c32 = arith.constant 32 : index
    %c0_10 = arith.constant 0 : index
    %7 = vector.load %arg4[%c32, %c0_10] : memref<80x128xf32, #tpu.memory_space<vmem>>, vector<4x1xf32>
    %c40 = arith.constant 40 : index
    %c0_11 = arith.constant 0 : index
    %8 = vector.load %arg4[%c40, %c0_11] : memref<80x128xf32, #tpu.memory_space<vmem>>, vector<8x8xf32>
    %c48 = arith.constant 48 : index
    %c0_12 = arith.constant 0 : index
    %9 = vector.load %arg4[%c48, %c0_12] : memref<80x128xf32, #tpu.memory_space<vmem>>, vector<8x4xf32>
    %c56 = arith.constant 56 : index
    %c0_13 = arith.constant 0 : index
    %10 = vector.load %arg4[%c56, %c0_13] : memref<80x128xf32, #tpu.memory_space<vmem>>, vector<8x1xf32>
    %c64 = arith.constant 64 : index
    %c0_14 = arith.constant 0 : index
    %11 = vector.load %arg4[%c64, %c0_14] : memref<80x128xf32, #tpu.memory_space<vmem>>, vector<8x1xf32>
    %c72 = arith.constant 72 : index
    %c0_15 = arith.constant 0 : index
    %12 = vector.load %arg4[%c72, %c0_15] : memref<80x128xf32, #tpu.memory_space<vmem>>, vector<1x1xf32>
    %cst = arith.constant dense<0.000000e+00> : vector<8x128xf32>
    %13 = tpu.matmul %3, %0, %cst {dimension_numbers = #tpu.dot_dimension_numbers<[1], [0], [0], [1], [0, 0, 1, 1], [], []>} : vector<8x12xf32>, vector<12x128xf32>, vector<8x128xf32> -> vector<8x128xf32>
    %14 = vector.broadcast %5 : vector<8x1xf32> to vector<8x128xf32>
    %15 = arith.addf %13, %14 : vector<8x128xf32>
    %16 = vector.extract_strided_slice %4 {offsets = [0, 0], sizes = [8, 1], strides = [1, 1]} : vector<8x4xf32> to vector<8x1xf32>
    %17 = vector.extract_strided_slice %1 {offsets = [0, 0], sizes = [1, 128], strides = [1, 1]} : vector<4x128xf32> to vector<1x128xf32>
    %18 = vector.broadcast %16 : vector<8x1xf32> to vector<8x128xf32>
    %19 = vector.broadcast %17 : vector<1x128xf32> to vector<8x128xf32>
    %20 = arith.mulf %18, %19 : vector<8x128xf32>
    %21 = arith.addf %15, %20 : vector<8x128xf32>
    %22 = vector.extract_strided_slice %4 {offsets = [0, 1], sizes = [8, 1], strides = [1, 1]} : vector<8x4xf32> to vector<8x1xf32>
    %23 = vector.extract_strided_slice %1 {offsets = [1, 0], sizes = [1, 128], strides = [1, 1]} : vector<4x128xf32> to vector<1x128xf32>
    %24 = vector.broadcast %22 : vector<8x1xf32> to vector<8x128xf32>
    %25 = vector.broadcast %23 : vector<1x128xf32> to vector<8x128xf32>
    %26 = arith.mulf %24, %25 : vector<8x128xf32>
    %27 = arith.addf %21, %26 : vector<8x128xf32>
    %28 = vector.extract_strided_slice %4 {offsets = [0, 2], sizes = [8, 1], strides = [1, 1]} : vector<8x4xf32> to vector<8x1xf32>
    %29 = vector.extract_strided_slice %1 {offsets = [2, 0], sizes = [1, 128], strides = [1, 1]} : vector<4x128xf32> to vector<1x128xf32>
    %30 = vector.broadcast %28 : vector<8x1xf32> to vector<8x128xf32>
    %31 = vector.broadcast %29 : vector<1x128xf32> to vector<8x128xf32>
    %32 = arith.mulf %30, %31 : vector<8x128xf32>
    %33 = arith.addf %27, %32 : vector<8x128xf32>
    %34 = vector.extract_strided_slice %4 {offsets = [0, 3], sizes = [8, 1], strides = [1, 1]} : vector<8x4xf32> to vector<8x1xf32>
    %35 = vector.extract_strided_slice %1 {offsets = [3, 0], sizes = [1, 128], strides = [1, 1]} : vector<4x128xf32> to vector<1x128xf32>
    %36 = vector.broadcast %34 : vector<8x1xf32> to vector<8x128xf32>
    %37 = vector.broadcast %35 : vector<1x128xf32> to vector<8x128xf32>
    %38 = arith.mulf %36, %37 : vector<8x128xf32>
    %39 = arith.addf %33, %38 : vector<8x128xf32>
    %cst_16 = arith.constant 0.000000e+00 : f32
    %40 = vector.broadcast %cst_16 : f32 to vector<8x128xf32>
    %41 = arith.maximumf %39, %40 : vector<8x128xf32>
    %cst_17 = arith.constant 0.000000e+00 : f32
    %42 = vector.broadcast %cst_17 : f32 to vector<4x128xf32>
    %c0_i32 = arith.constant 0 : i32
    %43 = vector.broadcast %c0_i32 : i32 to vector<1x128xi32>
    %44 = arith.cmpi eq, %2, %43 : vector<1x128xi32>
    %45 = arith.extui %44 : vector<1x128xi1> to vector<1x128xi32>
    %46 = arith.sitofp %45 : vector<1x128xi32> to vector<1x128xf32>
    %47 = vector.extract_strided_slice %6 {offsets = [0, 0], sizes = [4, 1], strides = [1, 1]} : vector<4x4xf32> to vector<4x1xf32>
    %48 = vector.broadcast %46 : vector<1x128xf32> to vector<4x128xf32>
    %49 = vector.broadcast %47 : vector<4x1xf32> to vector<4x128xf32>
    %50 = arith.mulf %48, %49 : vector<4x128xf32>
    %51 = arith.addf %42, %50 : vector<4x128xf32>
    %c1_i32 = arith.constant 1 : i32
    %52 = vector.broadcast %c1_i32 : i32 to vector<1x128xi32>
    %53 = arith.cmpi eq, %2, %52 : vector<1x128xi32>
    %54 = arith.extui %53 : vector<1x128xi1> to vector<1x128xi32>
    %55 = arith.sitofp %54 : vector<1x128xi32> to vector<1x128xf32>
    %56 = vector.extract_strided_slice %6 {offsets = [0, 1], sizes = [4, 1], strides = [1, 1]} : vector<4x4xf32> to vector<4x1xf32>
    %57 = vector.broadcast %55 : vector<1x128xf32> to vector<4x128xf32>
    %58 = vector.broadcast %56 : vector<4x1xf32> to vector<4x128xf32>
    %59 = arith.mulf %57, %58 : vector<4x128xf32>
    %60 = arith.addf %51, %59 : vector<4x128xf32>
    %c2_i32 = arith.constant 2 : i32
    %61 = vector.broadcast %c2_i32 : i32 to vector<1x128xi32>
    %62 = arith.cmpi eq, %2, %61 : vector<1x128xi32>
    %63 = arith.extui %62 : vector<1x128xi1> to vector<1x128xi32>
    %64 = arith.sitofp %63 : vector<1x128xi32> to vector<1x128xf32>
    %65 = vector.extract_strided_slice %6 {offsets = [0, 2], sizes = [4, 1], strides = [1, 1]} : vector<4x4xf32> to vector<4x1xf32>
    %66 = vector.broadcast %64 : vector<1x128xf32> to vector<4x128xf32>
    %67 = vector.broadcast %65 : vector<4x1xf32> to vector<4x128xf32>
    %68 = arith.mulf %66, %67 : vector<4x128xf32>
    %69 = arith.addf %60, %68 : vector<4x128xf32>
    %c3_i32 = arith.constant 3 : i32
    %70 = vector.broadcast %c3_i32 : i32 to vector<1x128xi32>
    %71 = arith.cmpi eq, %2, %70 : vector<1x128xi32>
    %72 = arith.extui %71 : vector<1x128xi1> to vector<1x128xi32>
    %73 = arith.sitofp %72 : vector<1x128xi32> to vector<1x128xf32>
    %74 = vector.extract_strided_slice %6 {offsets = [0, 3], sizes = [4, 1], strides = [1, 1]} : vector<4x4xf32> to vector<4x1xf32>
    %75 = vector.broadcast %73 : vector<1x128xf32> to vector<4x128xf32>
    %76 = vector.broadcast %74 : vector<4x1xf32> to vector<4x128xf32>
    %77 = arith.mulf %75, %76 : vector<4x128xf32>
    %78 = arith.addf %69, %77 : vector<4x128xf32>
    %79 = vector.broadcast %7 : vector<4x1xf32> to vector<4x128xf32>
    %80 = arith.addf %78, %79 : vector<4x128xf32>
    %cst_18 = arith.constant 0.000000e+00 : f32
    %81 = vector.broadcast %cst_18 : f32 to vector<4x128xf32>
    %82 = arith.maximumf %80, %81 : vector<4x128xf32>
    %cst_19 = arith.constant dense<0.000000e+00> : vector<8x128xf32>
    %83 = tpu.matmul %8, %41, %cst_19 {dimension_numbers = #tpu.dot_dimension_numbers<[1], [0], [0], [1], [0, 0, 1, 1], [], []>} : vector<8x8xf32>, vector<8x128xf32>, vector<8x128xf32> -> vector<8x128xf32>
    %84 = vector.broadcast %10 : vector<8x1xf32> to vector<8x128xf32>
    %85 = arith.addf %83, %84 : vector<8x128xf32>
    %86 = vector.extract_strided_slice %9 {offsets = [0, 0], sizes = [8, 1], strides = [1, 1]} : vector<8x4xf32> to vector<8x1xf32>
    %87 = vector.extract_strided_slice %82 {offsets = [0, 0], sizes = [1, 128], strides = [1, 1]} : vector<4x128xf32> to vector<1x128xf32>
    %88 = vector.broadcast %86 : vector<8x1xf32> to vector<8x128xf32>
    %89 = vector.broadcast %87 : vector<1x128xf32> to vector<8x128xf32>
    %90 = arith.mulf %88, %89 : vector<8x128xf32>
    %91 = arith.addf %85, %90 : vector<8x128xf32>
    %92 = vector.extract_strided_slice %9 {offsets = [0, 1], sizes = [8, 1], strides = [1, 1]} : vector<8x4xf32> to vector<8x1xf32>
    %93 = vector.extract_strided_slice %82 {offsets = [1, 0], sizes = [1, 128], strides = [1, 1]} : vector<4x128xf32> to vector<1x128xf32>
    %94 = vector.broadcast %92 : vector<8x1xf32> to vector<8x128xf32>
    %95 = vector.broadcast %93 : vector<1x128xf32> to vector<8x128xf32>
    %96 = arith.mulf %94, %95 : vector<8x128xf32>
    %97 = arith.addf %91, %96 : vector<8x128xf32>
    %98 = vector.extract_strided_slice %9 {offsets = [0, 2], sizes = [8, 1], strides = [1, 1]} : vector<8x4xf32> to vector<8x1xf32>
    %99 = vector.extract_strided_slice %82 {offsets = [2, 0], sizes = [1, 128], strides = [1, 1]} : vector<4x128xf32> to vector<1x128xf32>
    %100 = vector.broadcast %98 : vector<8x1xf32> to vector<8x128xf32>
    %101 = vector.broadcast %99 : vector<1x128xf32> to vector<8x128xf32>
    %102 = arith.mulf %100, %101 : vector<8x128xf32>
    %103 = arith.addf %97, %102 : vector<8x128xf32>
    %104 = vector.extract_strided_slice %9 {offsets = [0, 3], sizes = [8, 1], strides = [1, 1]} : vector<8x4xf32> to vector<8x1xf32>
    %105 = vector.extract_strided_slice %82 {offsets = [3, 0], sizes = [1, 128], strides = [1, 1]} : vector<4x128xf32> to vector<1x128xf32>
    %106 = vector.broadcast %104 : vector<8x1xf32> to vector<8x128xf32>
    %107 = vector.broadcast %105 : vector<1x128xf32> to vector<8x128xf32>
    %108 = arith.mulf %106, %107 : vector<8x128xf32>
    %109 = arith.addf %103, %108 : vector<8x128xf32>
    %cst_20 = arith.constant 0.000000e+00 : f32
    %110 = vector.broadcast %cst_20 : f32 to vector<8x128xf32>
    %111 = arith.maximumf %109, %110 : vector<8x128xf32>
    %112 = vector.broadcast %11 : vector<8x1xf32> to vector<8x128xf32>
    %113 = arith.mulf %111, %112 : vector<8x128xf32>
    %cst_21 = arith.constant dense<0.000000e+00> : vector<128xf32>
    %114 = vector.multi_reduction <add>, %113, %cst_21 [0] : vector<8x128xf32> to vector<128xf32>
    %115 = vector.shape_cast %114 : vector<128xf32> to vector<1x128xf32>
    %116 = vector.broadcast %12 : vector<1x1xf32> to vector<1x128xf32>
    %117 = arith.addf %115, %116 : vector<1x128xf32>
    %c0_22 = arith.constant 0 : index
    %c0_23 = arith.constant 0 : index
    %118 = vector.load %arg5[%c0_22, %c0_23] : memref<1x128xf32, #tpu.memory_space<vmem>>, vector<1x128xf32>
    tpu.vector_store %arg5[%c0_22, %c0_23], %117 {strides = array<i32>} : memref<1x128xf32, #tpu.memory_space<vmem>>, vector<1x128xf32>,
    return
  }
  func.func @transform_0(%arg0: i32) -> (i32, i32) {
    %c0_i32 = arith.constant 0 : i32
    %c0_i32_0 = arith.constant 0 : i32
    return %c0_i32, %arg0 : i32, i32
  }
  func.func @transform_1(%arg0: i32) -> (i32, i32) {
    %c0_i32 = arith.constant 0 : i32
    %c0_i32_0 = arith.constant 0 : i32
    return %c0_i32, %arg0 : i32, i32
  }
  func.func @transform_2(%arg0: i32) -> (i32, i32) {
    %c0_i32 = arith.constant 0 : i32
    %c0_i32_0 = arith.constant 0 : i32
    return %c0_i32, %arg0 : i32, i32
  }
  func.func @transform_3(%arg0: i32) -> (i32, i32) {
    %c0_i32 = arith.constant 0 : i32
    %c0_i32_0 = arith.constant 0 : i32
    %c0_i32_1 = arith.constant 0 : i32
    return %c0_i32, %c0_i32_0 : i32, i32
  }
  func.func @transform_4(%arg0: i32) -> (i32, i32) {
    %c0_i32 = arith.constant 0 : i32
    %c0_i32_0 = arith.constant 0 : i32
    return %c0_i32, %arg0 : i32, i32
  }
}

</mosaic_0001>

<bundles_post_ra>
// kernel: pareto_forward.1
= control target key start
LH: loop header
LB: loop body
LE: loop exit
PB: predicated region body
PF: predicated region fallthrough
CT: control target
= control target key end

     0   :  { %9 = vsyncpa [#allocation3], 0  ;;  %s453_s15 = smov [#allocation2]   ;;  %s528_s0 = inlined_call_operand.vmem [shape: f32[12,128], index: 0, kind: input, shape index: {}]   ;;  %s529_s1 = inlined_call_operand.vmem [shape: f32[4,128], index: 1, kind: input, shape index: {}]   ;;  %s530_s2 = inlined_call_operand.vmem [shape: s32[1,128], index: 2, kind: input, shape index: {}]   ;;  %s531_s3 = inlined_call_operand.hbm [shape: f32[80,128], index: 3, kind: input, shape index: {}]   ;;  %s532_s4 = inlined_call_operand.vmem [shape: f32[1,128], index: 4, kind: output, shape index: {}]  }
   0x1   :  { %s21_s16 = sshll.u32 %s453_s15, 4  ;;  %s22_s16 = int_to_ptr.vmem [resolvable:$true] %s21_s16 }
   0x2   :  { %s439_s17 = scalar_lea.vmem %s22_s16, 1280  ;;  %p444_p1 = scmp.lt.s32.totalorder %s22_s16, %s22_s16 }
   0x3   :  { %p440_p0 = scmp.ne.s32.totalorder %s22_s16, %s439_s17  ;;  %p445_p2 = scmp.lt.s32.totalorder %s439_s17, %s439_s17 }
   0x5   :  { %p446_p3 = por %p445_p2, %p444_p1 }
   0x7   :  { %p447_p4 = pnand %p446_p3, %p440_p0 }
   0x9   :  { %450 = shalt.err (!%p447_p4)
}
   0xa   :  { %s454_s18 = smov 128   ;;  %s455_s19 = smov 8  }
   0xb   :  { %27 = dma.hbm_to_vmem [thread:$0]  %s531_s3, 1280, %s22_s16, [#allocation3], %s454_s18, %s454_s18, %s455_s19  }
   0xc   :  { %451 = dma.done.wait [#allocation3], 1280  }
   0xd   :  { %452 = vsyncadd [#allocation3], 4294966016  ;;  %v456_v0 = vmov 0.0   ;;  %vm457_vm0 = vmmov 0   ;;  %v458_v1 = vmov 0   ;;  %v459_v2 = vmov 1  }
   0xe   :  { %395 = vmatprep.subr.mxu0 %v456_v0  ;;  %399 = vmatprep.mubr.msk.f32.mxu0 %vm457_vm0, %v456_v0  ;;  %vm54_vm1 = vcmask 1043456   ;;  %v32_v3 = vld [vmem:[%s528_s0 + $0x8] sm:$0xf]  ;;  %v31_v4 = vld [vmem:[%s528_s0] sm:$0xff]  ;;  %vm50_vm2 = vcmask 97280   ;;  %v37_v6 = vld [vmem:[#allocation2 + $0x10] sm:$0xff]  ;;  %v133_v16 = vlaneseq }
   0xf   :  { %416 = vset.pattern.permute.xlu0 %v458_v1  ;;  %417 = vset.pattern.permute.xlu1 %v459_v2  ;;  %v35_v5 = vld [vmem:[#allocation2] sm:$0xff]  ;;  %v36_v7 = vld [vmem:[#allocation2 + $0x8] sm:$0xff]  ;;  %v460_v8 = vmov 2   ;;  %v461_v9 = vmov 3   ;;  %v38_v10 = vld [vmem:[#allocation2 + $0x18] sm:$0xf] }
  0x10   :  { %402 = vmatprep.subr.mxu1 %v456_v0  ;;  %404 = vmatprep.mubr.msk.f32.mxu1 %vm457_vm0, %v456_v0  ;;  %v42_v11 = vld [vmem:[#allocation2 + $0x38] sm:$0xff]  ;;  %v41_v12 = vld [vmem:[#allocation2 + $0x30] sm:$0xff]  ;;  %v39_v13 = vld [vmem:[#allocation2 + $0x20] sm:$0xf]  ;;  %v501_v17 = vshrl.u32 %v133_v16, 7  ;;  %vm243_vm3 = vcmask 64512  }
  0x11   :  { %396 = vmatpush3.msk.msra.mxu0 %vm54_vm1, %v32_v3  ;;  %47 = vperm.xlu0 %416, %v37_v6   ;;  %v44_v14 = vld [vmem:[#allocation2 + $0x48] sm:$0x1]  ;;  %v43_v15 = vld [vmem:[#allocation2 + $0x40] sm:$0xff] }
  0x12   :  { %397 = vmatprep.subr.mxu0 %v456_v0  ;;  %140 = vperm.xlu1 %417, %v36_v7   ;;  %v504_v19 = vsub.s32 0, %v501_v17  ;;  %v33_v20 = vld [vmem:[%s529_s1] sm:$0xf]  ;;  %v145_v22 = vsub.s32 1, %v501_v17  ;;  %v155_v23 = vsub.s32 2, %v501_v17  ;;  %v165_v25 = vsub.s32 3, %v501_v17 }
  0x13   :  { %398 = vmatpush3.msra.mxu0 %v31_v4  ;;  %v40_v44 = vld [vmem:[#allocation2 + $0x28] sm:$0xff]  ;;  %v34_v45 = vld [vmem:[%s530_s2] sm:$0x1] }
  0x14   :  { %400 = vmatmul.mubr.msk.f32.vlgmr.msra.gmra.mxu0 %vm50_vm2, %v35_v5  ;;  %v136_v24 = vrot.slane %v33_v20, %v504_v19  ;;  %v146_v27 = vrot.slane %v33_v20, %v145_v22  ;;  %v156_v28 = vrot.slane %v33_v20, %v155_v23  ;;  %v166_v33 = vrot.slane %v33_v20, %v165_v25 }
  0x15   :  { %130 = vperm.xlu0 %416, %v36_v7   ;;  %vm170_vm4 = vcmp.eq.s32.totalorder %v34_v45, 0  ;;  %vm186_vm5 = vcmp.eq.s32.totalorder %v34_v45, 1  ;;  %vm201_vm6 = vcmp.eq.s32.totalorder %v34_v45, 2  ;;  %vm216_vm7 = vcmp.eq.s32.totalorder %v34_v45, 3 }
  0x16   :  { %418 = vset.pattern.permute.xlu1 %v460_v8  ;;  %v385_v47 = vsel %vm170_vm4, 1.0, %v456_v0  ;;  %v386_v48 = vsel %vm186_vm5, 1.0, %v456_v0  ;;  %v387_v51 = vsel %vm201_vm6, 1.0, %v456_v0  ;;  %v388_v56 = vsel %vm216_vm7, 1.0, %v456_v0 }
  0x17   :  { %150 = vperm.xlu1 %418, %v36_v7   ;;  %v177_v49 = vrot.slane %v385_v47, %v504_v19  ;;  %v193_v50 = vrot.slane %v386_v48, %v504_v19  ;;  %v208_v55 = vrot.slane %v387_v51, %v504_v19  ;;  %v223_v59 = vrot.slane %v388_v56, %v504_v19 }
  0x19   :  { %419 = vset.pattern.permute.xlu0 %v461_v9 }
  0x1a   :  { %160 = vperm.xlu0 %419, %v36_v7  }
  0x1b   :  { %420 = vset.pattern.permute.xlu1 %v458_v1 }
  0x1c   :  { %181 = vperm.xlu1 %420, %v38_v10  }
  0x1e   :  { %422 = vset.pattern.permute.xlu0 %v460_v8 }
  0x1f   :  { %211 = vperm.xlu0 %422, %v38_v10  }
  0x20   :  { %421 = vset.pattern.permute.xlu1 %v459_v2 }
  0x21   :  { %196 = vperm.xlu1 %421, %v38_v10  }
  0x23   :  { %425 = vset.pattern.permute.xlu0 %v458_v1 }
  0x24   :  { %240 = vperm.xlu0 %425, %v42_v11  }
  0x25   :  { %423 = vset.pattern.permute.xlu1 %v461_v9 }
  0x26   :  { %226 = vperm.xlu1 %423, %v38_v10  }
  0x28   :  { %427 = vset.pattern.permute.xlu0 %v460_v8 }
  0x29   :  { %339 = vperm.xlu0 %427, %v41_v12  }
  0x2a   :  { %424 = vset.pattern.permute.xlu1 %v458_v1 }
  0x2b   :  { %233 = vperm.xlu1 %424, %v39_v13  }
  0x2d   :  { %430 = vset.pattern.permute.xlu0 %v458_v1 }
  0x2e   :  { %373 = vperm.xlu0 %430, %v44_v14  }
  0x2f   :  { %319 = vperm.xlu1 %424, %v41_v12  }
  0x33   :  { %426 = vset.pattern.permute.xlu1 %v459_v2 }
  0x34   :  { %329 = vperm.xlu1 %426, %v41_v12  }
  0x38   :  { %428 = vset.pattern.permute.xlu1 %v461_v9 }
  0x39   :  { %349 = vperm.xlu1 %428, %v41_v12  }
  0x3d   :  { %429 = vset.pattern.permute.xlu1 %v458_v1 }
  0x3e   :  { %361 = vperm.xlu1 %429, %v43_v15  }
  0x8c   :  { %v48_v18 = vpop.permute.xlu0 %47 }
  0x8d   :  { %v141_v21 = vpop.permute.xlu1 %140 }
  0x8e   :  { %v147_v36 = vmul.f32 %v146_v27, %v141_v21 }
  0x90   :  { %v131_v26 = vpop.permute.xlu0 %130 }
  0x91   :  { %v137_v31 = vmul.f32 %v136_v24, %v131_v26 }
  0x92   :  { %v151_v30 = vpop.permute.xlu1 %150 }
  0x93   :  { %v157_v38 = vmul.f32 %v156_v28, %v151_v30 }
  0x95   :  { %v161_v35 = vpop.permute.xlu0 %160 }
  0x96   :  { %v167_v40 = vmul.f32 %v166_v33, %v161_v35 }
  0x97   :  { %v182_v46 = vpop.permute.xlu1 %181 }
  0x98   :  { %v184_v53 = vmul.f32 %v182_v46, %v177_v49 }
  0x9a   :  { %v212_v57 = vpop.permute.xlu0 %211 }
  0x9b   :  { %v214_v60 = vmul.f32 %v212_v57, %v208_v55 }
  0x9c   :  { %v197_v52 = vpop.permute.xlu1 %196 }
  0x9d   :  { %v199_v54 = vmul.f32 %v197_v52, %v193_v50 }
  0x9f   :  { %v200_v58 = vadd.f32 %v199_v54, %v184_v53  ;;  %v241_v6 = vpop.permute.xlu0 %240 }
  0xa1   :  { %v227_v61 = vpop.permute.xlu1 %226  ;;  %v215_v63 = vadd.f32 %v214_v60, %v200_v58 }
  0xa2   :  { %v229_v62 = vmul.f32 %v227_v61, %v223_v59 }
  0xa4   :  { %v230_v1 = vadd.f32 %v229_v62, %v215_v63  ;;  %v340_v13 = vpop.permute.xlu0 %339 }
  0xa6   :  { %v234_v2 = vpop.permute.xlu1 %233 }
  0xa7   :  { %v236_v3 = vadd.f32 %v234_v2, %v230_v1 }
  0xa9   :  { %v237_v5 = vmax.f32 %v236_v3, 0.0  ;;  %v374_v33 = vpop.permute.xlu0 %373 }
  0xaa   :  { %v320_v4 = vpop.permute.xlu1 %319 }
  0xab   :  { %v325_v7 = vrot.slane %v237_v5, %v504_v19  ;;  %v335_v9 = vrot.slane %v237_v5, %v145_v22  ;;  %v345_v11 = vrot.slane %v237_v5, %v155_v23  ;;  %v355_v16 = vrot.slane %v237_v5, %v165_v25 }
  0xad   :  { %v326_v0 = vmul.f32 %v325_v7, %v320_v4  ;;  %v346_v20 = vmul.f32 %v345_v11, %v340_v13 }
  0xaf   :  { %v330_v8 = vpop.permute.xlu1 %329 }
  0xb0   :  { %v336_v15 = vmul.f32 %v335_v9, %v330_v8 }
  0xd4   :  { %v124_v29 = vpop.f32.mrf.mxu0 }
  0xd5   :  { %v125_v32 = vadd.f32 %v124_v29, %v48_v18  ;;  %v350_v18 = vpop.permute.xlu1 %349 }
  0xd6   :  { %v401_v34 = vpop.f32.mrf.mxu0  ;;  %v356_v24 = vmul.f32 %v355_v16, %v350_v18 }
  0xd7   :  { %v138_v37 = vadd.f32 %v137_v31, %v125_v32 }
  0xd9   :  { %v148_v39 = vadd.f32 %v147_v36, %v138_v37  ;;  %v362_v28 = vpop.permute.xlu1 %361 }
  0xdb   :  { %v158_v41 = vadd.f32 %v157_v38, %v148_v39 }
  0xdd   :  { %v168_v42 = vadd.f32 %v167_v40, %v158_v41 }
  0xdf   :  { %v169_v43 = vmax.f32 %v168_v42, 0.0 }
  0xe1   :  { %403 = vmatpush3.msra.mxu1 %v169_v43 }
  0xe2   :  { %405 = vmatmul.mubr.msk.f32.vlgmr.msra.gmra.mxu1 %vm243_vm3, %v40_v44 }
 0x1a2   :  { %v313_v10 = vpop.f32.mrf.mxu1 }
 0x1a3   :  { %v314_v12 = vadd.f32 %v313_v10, %v241_v6 }
 0x1a4   :  { %v406_v14 = vpop.f32.mrf.mxu1 }
 0x1a5   :  { %v327_v17 = vadd.f32 %v326_v0, %v314_v12 }
 0x1a7   :  { %v337_v21 = vadd.f32 %v336_v15, %v327_v17 }
 0x1a9   :  { %v347_v26 = vadd.f32 %v346_v20, %v337_v21 }
 0x1ab   :  { %v357_v27 = vadd.f32 %v356_v24, %v347_v26 }
 0x1ad   :  { %v358_v29 = vmax.f32 %v357_v27, 0.0 }
 0x1af   :  { %v364_v19 = vmul.f32 %v362_v28, %v358_v29 }
 0x1b1   :  { %v365_v30 = vrot.slane %v364_v19, 4 }
 0x1b3   :  { %v366_v22 = vadd.f32 %v365_v30, %v364_v19 }
 0x1b5   :  { %v367_v31 = vrot.slane %v366_v22, 2 }
 0x1b7   :  { %v368_v32 = vadd.f32 %v367_v31, %v366_v22 }
 0x1b9   :  { %v369_v23 = vrot.slane %v368_v32, 1 }
 0x1bb   :  { %v370_v34 = vadd.f32 %v369_v23, %v368_v32 }
 0x1bd   :  { %v376_v35 = vadd.f32 %v374_v33, %v370_v34 }
 0x1bf   :  { %377 = vst [vmem:[%s532_s4] sm:$0x1] %v376_v35 }
 0x1c0   :  { %382 = vsyncpa [#allocation3], 1 }

</bundles_post_ra>
